<compile_context>
chip_gen: v6e
topology: v6e:2x2x1
jax: 0.10.0
libtpu: 0.0.40
codegen_flags: <defaults>
</compile_context>

<pallas_src>
import functools

import jax
import jax.numpy as jnp
from jax.experimental import pallas as pl
from jax.experimental.pallas import tpu as pltpu


DEFAULT_TILE_N = 4096  # rows per grid step (sweep 2048/4096/8192 if desired)


def _round_up(a, b):
    return ((a + b - 1) // b) * b


def _choose_tile_n(n, requested):
    """Pick a batch tile: multiple of 8, amortizes grid overhead, grid >= 2 for v7x."""
    if n <= 16:
        return n  # single full-extent block (legal even if n isn't a multiple of 8)
    # Keep at least 2 grid steps so v7x's ("parallel",) axis can use both TCs.
    half = _round_up(pl.cdiv(n, 2), 8)
    tile = min(_round_up(requested, 8), half)
    return max(tile, 8)


def _mlp_kernel(num_layers, *refs):
    """Fused MLP forward on one (TILE_N, F) batch tile.

    refs = (x_ref, w0_ref, b0_ref, w1_ref, b1_ref, ..., out_ref)
      x_ref: (TILE_N, F) f32   (cast to bf16 in-kernel for the MXU)
      w_i:   (in_i, out_i) bf16 (resident across grid steps)
      b_i:   (1, out_i) f32
      out:   (TILE_N, z_dim) f32

    ReLU after every layer except the last; final clamp(max=30).
    Accumulation and all elementwise work in f32; only MXU operands are bf16.
    """
    x_ref = refs[0]
    out_ref = refs[-1]
    param_refs = refs[1:-1]

    h = x_ref[...].astype(jnp.bfloat16)  # bf16 operand for the first matmul
    acc = None
    for layer in range(num_layers):
        w = param_refs[2 * layer][...]        # bf16
        b = param_refs[2 * layer + 1][...]    # f32, (1, out) -> broadcast add
        acc = jnp.dot(h, w, preferred_element_type=jnp.float32) + b
        if layer != num_layers - 1:
            acc = jnp.maximum(acc, 0.0)       # ReLU (popped after last Linear)
            h = acc.astype(jnp.bfloat16)      # bf16 operand for next matmul
    # torch.clamp(z_, max=30): upper bound only.
    out_ref[...] = jnp.minimum(acc, 30.0).astype(out_ref.dtype)


def net3_forward(x, weights, biases, *, tile_n=DEFAULT_TILE_N):
    """Run the fused Net3 forward pass via a single gridded pallas_call.

    Args:
      x: (N, input_size) float32
      weights: list of (in_i, out_i) float32 arrays (torch Linear weight, transposed)
      biases:  list of (1, out_i) float32 arrays
    Returns:
      (N, z_dim) float32, == clamp(MLP(x), max=30)
    """
    assert len(weights) == len(biases)
    num_layers = len(weights)
    n, f = x.shape
    z_dim = weights[-1].shape[1]

    tile_n = _choose_tile_n(n, tile_n)
    grid = (pl.cdiv(n, tile_n),)  # partial tail block handled by Pallas

    # Weights cast to bf16 once (tiny, VMEM-resident). Biases stay f32.
    flat_params = []
    for w, b in zip(weights, biases):
        flat_params.append(w.astype(jnp.bfloat16))
        flat_params.append(b.astype(jnp.float32))

    in_specs = [pl.BlockSpec((tile_n, f), lambda i: (i, 0))]
    for p in flat_params:
        # Constant index_map -> same block every grid step -> stays in VMEM.
        in_specs.append(pl.BlockSpec(p.shape, lambda i: (0, 0)))
    # Lane-narrow but byte-dense output: (tile_n, z_dim) f32, full last-dim block.
    out_specs = pl.BlockSpec((tile_n, z_dim), lambda i: (i, 0))

    flops = 2 * n * sum(int(w.shape[0]) * int(w.shape[1]) for w in weights)
    bytes_accessed = n * (f * 4 + z_dim * 4) + sum(
        int(p.size) * p.dtype.itemsize for p in flat_params)

    out = pl.pallas_call(
        functools.partial(_mlp_kernel, num_layers),
        out_shape=jax.ShapeDtypeStruct((n, z_dim), jnp.float32),
        grid=grid,
        in_specs=in_specs,
        out_specs=out_specs,
        compiler_params=pltpu.CompilerParams(
            dimension_semantics=("parallel",),      # v7x: shard batch tiles over 2 TCs
            vmem_limit_bytes=32 * 1024 * 1024,      # explicit: safe on v5e/v6e/v7x
        ),
        cost_estimate=pl.CostEstimate(
            flops=flops, transcendentals=0, bytes_accessed=bytes_accessed),
    )(x, *flat_params)

    return out


def init_net3_params(key, input_size, h_dim, z_dim):
    """Deterministic init mirroring torch.nn.Linear's default U(-1/sqrt(fan_in), 1/sqrt(fan_in))."""
    sizes = [input_size] + list(h_dim) + [z_dim]
    weights, biases = [], []
    for h0, h1 in zip(sizes, sizes[1:]):
        key, kw, kb = jax.random.split(key, 3)
        bound = 1.0 / (h0 ** 0.5)
        # Stored as (in, out) so the kernel does x @ W + b.
        w = jax.random.uniform(kw, (h0, h1), jnp.float32, -bound, bound)
        b = jax.random.uniform(kb, (1, h1), jnp.float32, -bound, bound)
        weights.append(w)
        biases.append(b)
    return weights, biases


def net3_reference(x, weights, biases, *, bf16_matmul=False):
    """Pure-JAX reference of the same forward pass."""
    h = x
    for i, (w, b) in enumerate(zip(weights, biases)):
        if bf16_matmul:
            h = jnp.dot(h.astype(jnp.bfloat16), w.astype(jnp.bfloat16),
                        preferred_element_type=jnp.float32) + b
        else:
            h = h @ w + b
        if i != len(weights) - 1:
            h = jnp.maximum(h, 0.0)
    return jnp.minimum(h, 30.0)


if __name__ == "__main__":
    key = jax.random.PRNGKey(0)

    # Small shapes consistent with Net3's forward: x is (n, ncov).
    input_size = 16
    h_dim = [32, 32]
    z_dim = 8

    key, kx1, kx2, kp = jax.random.split(key, 4)
    weights, biases = init_net3_params(kp, input_size, h_dim, z_dim)

    # 1) Tiny batch (single full-extent block).
    x_small = jax.random.normal(kx1, (8, input_size), jnp.float32)
    out_small = jax.block_until_ready(net3_forward(x_small, weights, biases))
    assert out_small.shape == (8, z_dim)

    # 2) Larger batch, not a multiple of the tile -> >=2 grid steps, partial tail block.
    x_big = jax.random.normal(kx2, (1000, input_size), jnp.float32)
    out_big = jax.block_until_ready(net3_forward(x_big, weights, biases))
    assert out_big.shape == (1000, z_dim)

    # Numerics: match the bf16-operand reference tightly, f32 reference loosely.
    ref_small_bf16 = net3_reference(x_small, weights, biases, bf16_matmul=True)
    ref_big_bf16 = net3_reference(x_big, weights, biases, bf16_matmul=True)
    assert jnp.allclose(out_small, ref_small_bf16, atol=2e-3, rtol=2e-3)
    assert jnp.allclose(out_big, ref_big_bf16, atol=2e-3, rtol=2e-3)

    ref_small_f32 = net3_reference(x_small, weights, biases)
    ref_big_f32 = net3_reference(x_big, weights, biases)
    assert jnp.allclose(out_small, ref_small_f32, atol=5e-2, rtol=5e-2)
    assert jnp.allclose(out_big, ref_big_f32, atol=5e-2, rtol=5e-2)

    print("KERNEL_OK")
</pallas_src>

<mosaic_0001>
module attributes {stable_mosaic.version = 11 : i64} {
  func.func @_mlp_kernel(%arg0: i32, %arg1: memref<8x16xf32, #tpu.memory_space<vmem>>, %arg2: memref<16x32xbf16, #tpu.memory_space<vmem>>, %arg3: memref<1x32xf32, #tpu.memory_space<vmem>>, %arg4: memref<32x32xbf16, #tpu.memory_space<vmem>>, %arg5: memref<1x32xf32, #tpu.memory_space<vmem>>, %arg6: memref<32x8xbf16, #tpu.memory_space<vmem>>, %arg7: memref<1x8xf32, #tpu.memory_space<vmem>>, %arg8: memref<8x8xf32, #tpu.memory_space<vmem>>) attributes {dimension_semantics = [#tpu.dimension_semantics<parallel>], iteration_bounds = array<i64: 1>, scalar_prefetch = 0 : i64, scratch_operands = 0 : i64, tpu.core_type = #tpu.core_type<tc>, window_params = [{transform_indices = @transform_0, window_bounds = array<i64: 8, 16>}, {pipeline_mode = #tpu.pipeline_mode<synchronous>, transform_indices = @transform_1, window_bounds = array<i64: 16, 32>}, {pipeline_mode = #tpu.pipeline_mode<synchronous>, transform_indices = @transform_2, window_bounds = array<i64: 1, 32>}, {pipeline_mode = #tpu.pipeline_mode<synchronous>, transform_indices = @transform_3, window_bounds = array<i64: 32, 32>}, {pipeline_mode = #tpu.pipeline_mode<synchronous>, transform_indices = @transform_4, window_bounds = array<i64: 1, 32>}, {pipeline_mode = #tpu.pipeline_mode<synchronous>, transform_indices = @transform_5, window_bounds = array<i64: 32, 8>}, {pipeline_mode = #tpu.pipeline_mode<synchronous>, transform_indices = @transform_6, window_bounds = array<i64: 1, 8>}, {transform_indices = @transform_7, window_bounds = array<i64: 8, 8>}]} {
    %c0 = arith.constant 0 : index
    %c0_0 = arith.constant 0 : index
    %0 = vector.load %arg1[%c0, %c0_0] : memref<8x16xf32, #tpu.memory_space<vmem>>, vector<8x16xf32>
    %1 = arith.truncf %0 : vector<8x16xf32> to vector<8x16xbf16>
    %c0_1 = arith.constant 0 : index
    %c0_2 = arith.constant 0 : index
    %2 = vector.load %arg2[%c0_1, %c0_2] : memref<16x32xbf16, #tpu.memory_space<vmem>>, vector<16x32xbf16>
    %c0_3 = arith.constant 0 : index
    %c0_4 = arith.constant 0 : index
    %3 = vector.load %arg3[%c0_3, %c0_4] : memref<1x32xf32, #tpu.memory_space<vmem>>, vector<1x32xf32>
    %cst = arith.constant dense<0.000000e+00> : vector<8x32xf32>
    %4 = tpu.matmul %1, %2, %cst {dimension_numbers = #tpu.dot_dimension_numbers<[1], [0], [0], [1], [0, 0, 1, 1], [], []>} : vector<8x16xbf16>, vector<16x32xbf16>, vector<8x32xf32> -> vector<8x32xf32>
    %5 = vector.broadcast %3 : vector<1x32xf32> to vector<8x32xf32>
    %6 = arith.addf %4, %5 : vector<8x32xf32>
    %cst_5 = arith.constant 0.000000e+00 : f32
    %7 = vector.broadcast %cst_5 : f32 to vector<8x32xf32>
    %8 = arith.maximumf %6, %7 : vector<8x32xf32>
    %9 = arith.truncf %8 : vector<8x32xf32> to vector<8x32xbf16>
    %c0_6 = arith.constant 0 : index
    %c0_7 = arith.constant 0 : index
    %10 = vector.load %arg4[%c0_6, %c0_7] : memref<32x32xbf16, #tpu.memory_space<vmem>>, vector<32x32xbf16>
    %c0_8 = arith.constant 0 : index
    %c0_9 = arith.constant 0 : index
    %11 = vector.load %arg5[%c0_8, %c0_9] : memref<1x32xf32, #tpu.memory_space<vmem>>, vector<1x32xf32>
    %cst_10 = arith.constant dense<0.000000e+00> : vector<8x32xf32>
    %12 = tpu.matmul %9, %10, %cst_10 {dimension_numbers = #tpu.dot_dimension_numbers<[1], [0], [0], [1], [0, 0, 1, 1], [], []>} : vector<8x32xbf16>, vector<32x32xbf16>, vector<8x32xf32> -> vector<8x32xf32>
    %13 = vector.broadcast %11 : vector<1x32xf32> to vector<8x32xf32>
    %14 = arith.addf %12, %13 : vector<8x32xf32>
    %cst_11 = arith.constant 0.000000e+00 : f32
    %15 = vector.broadcast %cst_11 : f32 to vector<8x32xf32>
    %16 = arith.maximumf %14, %15 : vector<8x32xf32>
    %17 = arith.truncf %16 : vector<8x32xf32> to vector<8x32xbf16>
    %c0_12 = arith.constant 0 : index
    %c0_13 = arith.constant 0 : index
    %18 = vector.load %arg6[%c0_12, %c0_13] : memref<32x8xbf16, #tpu.memory_space<vmem>>, vector<32x8xbf16>
    %c0_14 = arith.constant 0 : index
    %c0_15 = arith.constant 0 : index
    %19 = vector.load %arg7[%c0_14, %c0_15] : memref<1x8xf32, #tpu.memory_space<vmem>>, vector<1x8xf32>
    %cst_16 = arith.constant dense<0.000000e+00> : vector<8x8xf32>
    %20 = tpu.matmul %17, %18, %cst_16 {dimension_numbers = #tpu.dot_dimension_numbers<[1], [0], [0], [1], [0, 0, 1, 1], [], []>} : vector<8x32xbf16>, vector<32x8xbf16>, vector<8x8xf32> -> vector<8x8xf32>
    %21 = vector.broadcast %19 : vector<1x8xf32> to vector<8x8xf32>
    %22 = arith.addf %20, %21 : vector<8x8xf32>
    %cst_17 = arith.constant 3.000000e+01 : f32
    %23 = vector.broadcast %cst_17 : f32 to vector<8x8xf32>
    %24 = arith.minimumf %22, %23 : vector<8x8xf32>
    %c0_18 = arith.constant 0 : index
    %c0_19 = arith.constant 0 : index
    %25 = vector.load %arg8[%c0_18, %c0_19] : memref<8x8xf32, #tpu.memory_space<vmem>>, vector<8x8xf32>
    tpu.vector_store %arg8[%c0_18, %c0_19], %24 {strides = array<i32>} : memref<8x8xf32, #tpu.memory_space<vmem>>, vector<8x8xf32>,
    return
  }
  func.func @transform_0(%arg0: i32) -> (i32, i32) {
    %c0_i32 = arith.constant 0 : i32
    %c0_i32_0 = arith.constant 0 : i32
    return %arg0, %c0_i32 : i32, i32
  }
  func.func @transform_1(%arg0: i32) -> (i32, i32) {
    %c0_i32 = arith.constant 0 : i32
    %c0_i32_0 = arith.constant 0 : i32
    %c0_i32_1 = arith.constant 0 : i32
    return %c0_i32, %c0_i32_0 : i32, i32
  }
  func.func @transform_2(%arg0: i32) -> (i32, i32) {
    %c0_i32 = arith.constant 0 : i32
    %c0_i32_0 = arith.constant 0 : i32
    %c0_i32_1 = arith.constant 0 : i32
    return %c0_i32, %c0_i32_0 : i32, i32
  }
  func.func @transform_3(%arg0: i32) -> (i32, i32) {
    %c0_i32 = arith.constant 0 : i32
    %c0_i32_0 = arith.constant 0 : i32
    %c0_i32_1 = arith.constant 0 : i32
    return %c0_i32, %c0_i32_0 : i32, i32
  }
  func.func @transform_4(%arg0: i32) -> (i32, i32) {
    %c0_i32 = arith.constant 0 : i32
    %c0_i32_0 = arith.constant 0 : i32
    %c0_i32_1 = arith.constant 0 : i32
    return %c0_i32, %c0_i32_0 : i32, i32
  }
  func.func @transform_5(%arg0: i32) -> (i32, i32) {
    %c0_i32 = arith.constant 0 : i32
    %c0_i32_0 = arith.constant 0 : i32
    %c0_i32_1 = arith.constant 0 : i32
    return %c0_i32, %c0_i32_0 : i32, i32
  }
  func.func @transform_6(%arg0: i32) -> (i32, i32) {
    %c0_i32 = arith.constant 0 : i32
    %c0_i32_0 = arith.constant 0 : i32
    %c0_i32_1 = arith.constant 0 : i32
    return %c0_i32, %c0_i32_0 : i32, i32
  }
  func.func @transform_7(%arg0: i32) -> (i32, i32) {
    %c0_i32 = arith.constant 0 : i32
    %c0_i32_0 = arith.constant 0 : i32
    return %arg0, %c0_i32 : i32, i32
  }
}

</mosaic_0001>

<bundles_post_ra>
// kernel: tpu_custom_call.1
= control target key start
LH: loop header
LB: loop body
LE: loop exit
PB: predicated region body
PF: predicated region fallthrough
CT: control target
= control target key end

     0   :  { %12 = vsyncpa [#allocation3], 0  ;;  %s467_s0 = inlined_call_operand.vmem [shape: f32[8,16], index: 0, kind: input, shape index: {}]   ;;  %s468_s1 = inlined_call_operand.hbm [shape: bf16[16,32], index: 1, kind: input, shape index: {}]   ;;  %s469_s2 = inlined_call_operand.vmem [shape: f32[1,32], index: 2, kind: input, shape index: {}]   ;;  %s470_s3 = inlined_call_operand.vmem [shape: bf16[32,32], index: 3, kind: input, shape index: {}]   ;;  %s471_s4 = inlined_call_operand.hbm [shape: f32[1,32], index: 4, kind: input, shape index: {}]   ;;  %s472_s5 = inlined_call_operand.vmem [shape: bf16[32,8], index: 5, kind: input, shape index: {}]   ;;  %s473_s6 = inlined_call_operand.vmem [shape: f32[1,8], index: 6, kind: input, shape index: {}]   ;;  %s474_s7 = inlined_call_operand.hbm [shape: f32[8,8], index: 7, kind: output, shape index: {}]  }
   0x1   :  { %13 = vsyncpa [#allocation6], 0 }
   0x2   :  { %14 = vsyncpa [#allocation4], 0  ;;  %s390_s24 = smov [#allocation2]  }
   0x3   :  { %s22_s25 = sshll.u32 %s390_s24, 4  ;;  %s23_s25 = int_to_ptr.vmem [resolvable:$true] %s22_s25 }
   0x4   :  { %s332_s26 = scalar_lea.vmem %s23_s25, 128  ;;  %p337_p1 = scmp.lt.s32.totalorder %s23_s25, %s23_s25 }
   0x5   :  { %p333_p0 = scmp.ne.s32.totalorder %s23_s25, %s332_s26  ;;  %p338_p2 = scmp.lt.s32.totalorder %s332_s26, %s332_s26 }
   0x7   :  { %p339_p3 = por %p338_p2, %p337_p1 }
   0x9   :  { %p340_p4 = pnand %p339_p3, %p333_p0 }
   0xb   :  { %343 = shalt.err (!%p340_p4)
}
   0xc   :  { %s391_s27 = smov 64   ;;  %s392_s28 = smov 4  }
   0xd   :  { %28 = dma.hbm_to_vmem [thread:$0]  %s468_s1, 128, %s23_s25, [#allocation3], %s391_s27, %s391_s27, %s392_s28  }
   0xe   :  { %s393_s8 = smov [#allocation5]  }
   0xf   :  { %s39_s9 = sshll.u32 %s393_s8, 4  ;;  %s40_s9 = int_to_ptr.vmem [resolvable:$true] %s39_s9 }
  0x10   :  { %s352_s10 = scalar_lea.vmem %s40_s9, 16  ;;  %s356_s11 = scalar_lea.vmem %s40_s9, 32 }
  0x11   :  { %p353_p5 = scmp.ne.s32.totalorder %s40_s9, %s352_s10  ;;  %p357_p6 = scmp.lt.s32.totalorder %s40_s9, %s40_s9 }
  0x12   :  { %p358_p7 = scmp.lt.s32.totalorder %s356_s11, %s352_s10 }
  0x14   :  { %p359_p8 = por %p358_p7, %p357_p6 }
  0x16   :  { %p360_p9 = pnand %p359_p8, %p353_p5 }
  0x18   :  { %363 = shalt.err (!%p360_p9)
}
  0x19   :  { %42 = dma.hbm_to_vmem [thread:$0]  %s471_s4, 16, %s40_s9, [#allocation6]  }
  0x1a   :  { %384 = dma.done.wait [#allocation3], 128  }
  0x1b   :  { %385 = vsyncadd [#allocation3], 4294967168 }
  0x1c   :  { %386 = dma.done.wait [#allocation6], 16  }
  0x1d   :  { %387 = vsyncadd [#allocation6], 4294967280  ;;  %v394_v0 = vmov 0.0   ;;  %vm395_vm0 = vmmov 0   ;;  %v319_v1 = vld [vmem:[#allocation2] sm:$0xff]   ;;  %vm71_vm1 = vcmask 130048  }
  0x1e   :  { %290 = vmatprep.subr.bf16.mxu0 %v394_v0  ;;  %292 = vmatprep.mubr.msk.bf16.mxu0 %vm395_vm0, %v394_v0  ;;  %v54_v2 = vld [vmem:[%s467_s0] sm:$0xff]  ;;  %v320_v4 = vld [vmem:[%s470_s3 + $0x8] sm:$0xff]   ;;  %vm140_vm2 = vcmask 261120   ;;  %s396_s23 = smov [#allocation7]   ;;  %vm253_vm3 = vcmask 64512  }
  0x1f   :  { %296 = vmatprep.subr.bf16.mxu1 %v394_v0  ;;  %300 = vmatprep.mubr.msk.bf16.mxu1 %vm395_vm0, %v394_v0  ;;  %v55_v3 = vpack.c.bf16 %v54_v2, %v54_v2  ;;  %v321_v5 = vld [vmem:[%s470_s3] sm:$0xff]   ;;  %v322_v6 = vld [vmem:[%s472_s5 + $0x8] sm:$0xff]   ;;  %s261_s24 = sshll.u32 %s396_s23, 4  ;;  %s262_s24 = int_to_ptr.vmem [resolvable:$true] %s261_s24 }
  0x20   :  { %291 = vmatpush3.bf16.msra.mxu0 %v319_v1  ;;  %297 = vmatpush3.bf16.msra.mxu1 %v320_v4  ;;  %v271_v7 = vld [vmem:[%s469_s2] ss:$0 sm:$0xff]  ;;  %v274_v16 = vld [vmem:[#allocation5] ss:$0 sm:$0xff]  ;;  %p369_p11 = scmp.lt.s32.totalorder %s262_s24, %s262_s24 }
  0x21   :  { %304 = vmatprep.subr.bf16.mxu0 %v394_v0  ;;  %298 = vmatprep.subr.bf16.mxu1 %v394_v0  ;;  %v323_v15 = vld [vmem:[%s472_s5] sm:$0xff]   ;;  %s364_s5 = scalar_lea.vmem %s262_s24, 128 }
  0x22   :  { %v278_v24 = vld [vmem:[%s473_s6] ss:$0 sm:$0xff]  ;;  %p365_p10 = scmp.ne.s32.totalorder %s262_s24, %s364_s5  ;;  %p370_p12 = scmp.lt.s32.totalorder %s364_s5, %s364_s5 }
  0x23   :  { %293 = vmatmul.mubr.msk.bf16.vlgmr.msra.gmra.mxu0 %vm71_vm1, %v55_v3 }
  0x24   :  { %308 = vmatprep.mubr.msk.bf16.mxu0 %vm395_vm0, %v394_v0  ;;  %299 = vmatpush3.bf16.msra.mxu1 %v321_v5  ;;  %p371_p13 = por %p370_p12, %p369_p11 }
  0x25   :  { %305 = vmatpush3.bf16.msra.mxu0 %v322_v6 }
  0x26   :  { %306 = vmatprep.subr.bf16.mxu0 %v394_v0  ;;  %p372_p0 = pnand %p371_p13, %p365_p10 }
  0x29   :  { %307 = vmatpush3.bf16.msra.mxu0 %v323_v15 }
  0xe3   :  { %v109_v8 = vpop.f32.mrf.mxu0 }
  0xe4   :  { %v110_v9 = vadd.f32 %v271_v7, %v109_v8 }
  0xe5   :  { %v294_v10 = vpop.f32.mrf.mxu0 }
  0xe6   :  { %v115_v11 = vmax.f32 %v110_v9, 0.0 }
  0xe7   :  { %v112_v12 = vpop.f32.mrf.mxu0 }
  0xe8   :  { %v116_v13 = vpack.c.bf16 %v115_v11, %v115_v11 }
  0xe9   :  { %v295_v14 = vpop.f32.mrf.mxu0 }
  0xea   :  { %301 = vmatmul.mubr.msk.bf16.vlgmr.msra.gmra.mxu1 %vm140_vm2, %v116_v13 }
 0x1aa   :  { %v178_v17 = vpop.f32.mrf.mxu1 }
 0x1ab   :  { %v179_v18 = vadd.f32 %v274_v16, %v178_v17 }
 0x1ac   :  { %v302_v19 = vpop.f32.mrf.mxu1 }
 0x1ad   :  { %v184_v20 = vmax.f32 %v179_v18, 0.0 }
 0x1ae   :  { %v181_v21 = vpop.f32.mrf.mxu1 }
 0x1af   :  { %v185_v22 = vpack.c.bf16 %v184_v20, %v184_v20 }
 0x1b0   :  { %v303_v23 = vpop.f32.mrf.mxu1 }
 0x1b1   :  { %309 = vmatmul.mubr.msk.bf16.vlgmr.msra.gmra.mxu0 %vm140_vm2, %v185_v22 }
 0x271   :  { %v246_v25 = vpop.f32.mrf.mxu0 }
 0x272   :  { %v247_v26 = vadd.f32 %v278_v24, %v246_v25 }
 0x273   :  { %v310_v27 = vpop.f32.mrf.mxu0 }
 0x274   :  { %v252_v28 = vmin.f32 %v247_v26, 30.0 }
 0x275   :  { %v249_v29 = vpop.f32.mrf.mxu0 }
 0x276   :  { %254 = vst.msk [vmem:[#allocation7] sm:$0xff] %vm253_vm3, %v252_v28 }
 0x277   :  { %v311_v30 = vpop.f32.mrf.mxu0 }
 0x278   :  { %375 = shalt.err (!%p372_p0)
}
 0x279   :  { %264 = dma.vmem_to_hbm [thread:$0]  %s262_s24, 128, %s474_s7, [#allocation4]  }
 0x27a   :  { %388 = dma.done.wait [#allocation4], 128  }
 0x27b   :  { %389 = vsyncadd [#allocation4], 4294967168 }
 0x27c   :  { %268 = vsyncpa [#allocation3], 1 }
 0x27d   :  { %269 = vsyncpa [#allocation6], 1 }
 0x27e   :  { %270 = vsyncpa [#allocation4], 1 }

</bundles_post_ra>
